<compile_context>
chip_gen: v6e
topology: v6e:2x2x1
jax: 0.10.0
libtpu: 0.0.40
codegen_flags: <defaults>
</compile_context>

<pallas_src>
import math
import functools

import jax
import jax.numpy as jnp
from jax.experimental import pallas as pl
from jax.experimental.pallas import tpu as pltpu


def make_pe_table(dim_model: int, max_len: int) -> jnp.ndarray:
    """Deterministic sin/cos positional table, shape (max_len, 1, dim_model)."""
    position = jnp.arange(max_len, dtype=jnp.float32)[:, None]            # (L, 1)
    div_term = jnp.exp(
        jnp.arange(0, dim_model, 2, dtype=jnp.float32)
        * (-math.log(10000.0) / dim_model)
    )                                                                      # (D/2,)
    pe = jnp.zeros((max_len, dim_model), dtype=jnp.float32)
    pe = pe.at[:, 0::2].set(jnp.sin(position * div_term))
    pe = pe.at[:, 1::2].set(jnp.cos(position * div_term))
    return pe[:, None, :]                                                  # (L, 1, D)


# ---------------------------------------------------------------------------
# Kernels
# ---------------------------------------------------------------------------

def _pe_add_kernel(x_ref, pe_ref, o_ref):
    # x tile: (tS, B, D); pe tile: (tS, D) -> broadcast over batch (sublanes).
    o_ref[...] = x_ref[...] + pe_ref[...][:, None, :]


def _pe_add_dropout_kernel(x_ref, pe_ref, o_ref, *, threshold, scale, seed_mixed):
    y = x_ref[...] + pe_ref[...][:, None, :]
    tS, B, D = y.shape

    # Global element index: unique across the whole (S, B, D) tensor, so every
    # tile draws an independent bit stream and masks never repeat across tiles.
    # (Tail tiles hash padded rows too; harmless, those rows are masked on store.)
    row = jax.lax.broadcasted_iota(jnp.int32, y.shape, 0).astype(jnp.uint32)
    bb = jax.lax.broadcasted_iota(jnp.int32, y.shape, 1).astype(jnp.uint32)
    dd = jax.lax.broadcasted_iota(jnp.int32, y.shape, 2).astype(jnp.uint32)
    grow = (pl.program_id(0) * tS).astype(jnp.uint32) + row
    idx = (grow * jnp.uint32(B) + bb) * jnp.uint32(D) + dd

    # splitmix32-style finalizer over (index, seed): a handful of VPU int ops
    # per element -- free filler under the HBM roofline on v5e/v6e/v7x.
    h = idx ^ jnp.uint32(seed_mixed)
    h = (h ^ (h >> 16)) * jnp.uint32(0x7FEB352D)
    h = (h ^ (h >> 15)) * jnp.uint32(0x846CA68B)
    h = h ^ (h >> 16)

    # Integer-threshold compare: P(keep) = 1 - threshold / 2^32 = 1 - p.
    keep = h >= jnp.uint32(threshold)
    # Inverted dropout: kept activations scaled by 1/(1-p), dropped set to 0.
    o_ref[...] = jnp.where(keep, y * scale, jnp.zeros_like(y)).astype(o_ref.dtype)


# ---------------------------------------------------------------------------
# Wrapper
# ---------------------------------------------------------------------------

def positional_encoding(x, pe_table, *, p=0.1, training=False, seed=0,
                        tile_bytes=4 * 1024 * 1024, min_grid_steps=8):
    """x: (S, B, D). Returns dropout(x + pe[:S]) (dropout only if training)."""
    S, B, D = x.shape
    itemsize = jnp.dtype(x.dtype).itemsize

    # pe as a dense 2-D (S, D) operand; cast once in the wrapper so the
    # in-kernel add runs in x's dtype.  NOTE: for bf16 activations PyTorch
    # would promote to f32 for the add (type promotion with the f32 buffer);
    # here we stay in x's dtype -- statistically equivalent, not bit-exact.
    pe = pe_table[:S, 0, :].astype(x.dtype)

    # --- Tile the sequence axis ------------------------------------------------
    # Target ~tile_bytes per x/out tile (measured streaming-add data: ~85% of
    # HBM roofline at 1-4 MiB tiles), but also keep >= min_grid_steps grid
    # steps so double-buffering hides DMA and both v7x TensorCores get work.
    # tS must be a multiple of 8 (pe's sublane dim) unless it covers all of S.
    row_bytes = B * D * itemsize
    tS = max(1, min(S, tile_bytes // max(row_bytes, 1)))
    cap = max(8, ((pl.cdiv(S, min_grid_steps) + 7) // 8) * 8)
    tS = min(tS, cap, S)
    if tS < S:
        tS = max(8, (tS // 8) * 8)
    grid = (pl.cdiv(S, tS),)
    # TODO(synk): if a single row (B*D) is itself multiple MiB, tile over B/D
    # as well instead of forcing 8 rows per tile.

    # Double-buffered VMEM footprint: 2 x (x tile + out tile + pe tile).
    needed = 2 * itemsize * (2 * tS * B * D + tS * D)
    vmem_limit = min(max(needed + 4 * 1024 * 1024, 32 * 1024 * 1024),
                     56 * 1024 * 1024)   # stays under v7x's 64 MiB physical VMEM

    # All grid steps are independent (pure elementwise): mark parallel so the
    # two TensorCores on v7x can split the grid.  Harmless on v5e/v6e.
    cparams = pltpu.CompilerParams(dimension_semantics=("parallel",),
                                   vmem_limit_bytes=vmem_limit)

    # Advisory cost hint: purely memory bound (x in + out + pe in), no MXU/EUP.
    cost = pl.CostEstimate(flops=S * B * D, transcendentals=0,
                           bytes_accessed=(2 * S * B * D + S * D) * itemsize)

    x_spec = pl.BlockSpec((tS, B, D), lambda i: (i, 0, 0))
    pe_spec = pl.BlockSpec((tS, D), lambda i: (i, 0))
    out_spec = pl.BlockSpec((tS, B, D), lambda i: (i, 0, 0))
    out_shape = jax.ShapeDtypeStruct((S, B, D), x.dtype)

    # TODO(synk): production callers should keep D % 128 == 0 for lane-dense
    # stores; for small-D models fold (B, D) into the lane axis and replicate
    # pe across B in-kernel instead.
    # TODO(synk): pass input_output_aliases (x -> out) when the caller donates
    # x -- saves the output HBM allocation (footprint, not bandwidth).

    if (not training) or p <= 0.0:
        return pl.pallas_call(
            _pe_add_kernel,
            out_shape=out_shape,
            grid_spec=pltpu.PrefetchScalarGridSpec(
                num_scalar_prefetch=0, grid=grid,
                in_specs=[x_spec, pe_spec], out_specs=out_spec),
            compiler_params=cparams,
            cost_estimate=cost,
        )(x, pe)

    if p >= 1.0:   # degenerate edge case: drop everything exactly
        return jnp.zeros((S, B, D), x.dtype)

    # Training mode: stochastic inverted dropout (statistically matches
    # torch.nn.Dropout; the Philox bit stream is not reproduced bit-for-bit).
    threshold = min(int(round(p * (2 ** 32))), 2 ** 32 - 1)
    scale = 1.0 / (1.0 - p)
    # Large-odd-constant seed mixing so nearby seeds give unrelated masks.
    seed_mixed = (int(seed) * 0x9E3779B1 + 0x85EBCA6B) & 0xFFFFFFFF
    # TODO(synk): the seed is baked in as a compile-time constant (recompiles
    # per seed); feed a per-call counter through SMEM scalar prefetch instead.

    return pl.pallas_call(
        functools.partial(_pe_add_dropout_kernel, threshold=threshold,
                          scale=scale, seed_mixed=seed_mixed),
        out_shape=out_shape,
        grid_spec=pltpu.PrefetchScalarGridSpec(
            num_scalar_prefetch=0, grid=grid,
            in_specs=[x_spec, pe_spec], out_specs=out_spec),
        compiler_params=cparams,
        cost_estimate=cost,
    )(x, pe)


# ---------------------------------------------------------------------------
# Demo / self-test
# ---------------------------------------------------------------------------

if __name__ == "__main__":
    dim_model = 32
    max_len = 20
    S, B = 8, 2
    p_drop = 0.1

    pe_table = make_pe_table(dim_model, max_len)

    key = jax.random.PRNGKey(0)
    x = jax.random.normal(key, (S, B, dim_model), dtype=jnp.float32)

    ref = x + pe_table[:S]

    # Eval-mode forward (dropout = identity).
    out = positional_encoding(x, pe_table, p=p_drop, training=False)
    out = jax.block_until_ready(out)
    assert out.shape == (S, B, dim_model)
    assert jnp.allclose(out, ref, atol=1e-6), "eval output mismatch vs reference"

    # Training-mode forward (exercises the dropout kernel path).
    out_tr = positional_encoding(x, pe_table, p=p_drop, training=True, seed=123)
    out_tr = jax.block_until_ready(out_tr)
    assert out_tr.shape == (S, B, dim_model)

    # Every element must be either dropped (0) or the kept value scaled 1/(1-p).
    scale = 1.0 / (1.0 - p_drop)
    scaled = ref * scale
    ok = jnp.logical_or(jnp.isclose(out_tr, 0.0),
                        jnp.isclose(out_tr, scaled, atol=1e-5))
    assert bool(jnp.all(ok)), "dropout output is not a masked/scaled (x + pe)"

    # Sanity band on the empirical drop rate (512 draws, p = 0.1).
    drop_frac = float(jnp.mean(jnp.isclose(out_tr, 0.0).astype(jnp.float32)))
    assert 0.01 <= drop_frac <= 0.35, f"implausible drop fraction {drop_frac}"

    print("KERNEL_OK")
</pallas_src>

<mosaic_0001>
module attributes {stable_mosaic.version = 11 : i64} {
  func.func @_pe_add_kernel(%arg0: i32, %arg1: memref<8x2x32xf32, #tpu.memory_space<vmem>>, %arg2: memref<8x32xf32, #tpu.memory_space<vmem>>, %arg3: memref<8x2x32xf32, #tpu.memory_space<vmem>>) attributes {dimension_semantics = [#tpu.dimension_semantics<parallel>], iteration_bounds = array<i64: 1>, scalar_prefetch = 0 : i64, scratch_operands = 0 : i64, tpu.core_type = #tpu.core_type<tc>, window_params = [{transform_indices = @transform_0, window_bounds = array<i64: 8, 2, 32>}, {transform_indices = @transform_1, window_bounds = array<i64: 8, 32>}, {transform_indices = @transform_2, window_bounds = array<i64: 8, 2, 32>}]} {
    %c0 = arith.constant 0 : index
    %c0_0 = arith.constant 0 : index
    %c0_1 = arith.constant 0 : index
    %0 = vector.load %arg1[%c0, %c0_0, %c0_1] : memref<8x2x32xf32, #tpu.memory_space<vmem>>, vector<8x2x32xf32>
    %c0_2 = arith.constant 0 : index
    %c0_3 = arith.constant 0 : index
    %1 = vector.load %arg2[%c0_2, %c0_3] : memref<8x32xf32, #tpu.memory_space<vmem>>, vector<8x32xf32>
    %2 = vector.shape_cast %1 : vector<8x32xf32> to vector<8x1x32xf32>
    %3 = vector.broadcast %2 : vector<8x1x32xf32> to vector<8x2x32xf32>
    %4 = arith.addf %0, %3 : vector<8x2x32xf32>
    %c0_4 = arith.constant 0 : index
    %c0_5 = arith.constant 0 : index
    %c0_6 = arith.constant 0 : index
    %5 = vector.load %arg3[%c0_4, %c0_5, %c0_6] : memref<8x2x32xf32, #tpu.memory_space<vmem>>, vector<8x2x32xf32>
    tpu.vector_store %arg3[%c0_4, %c0_5, %c0_6], %4 {strides = array<i32>} : memref<8x2x32xf32, #tpu.memory_space<vmem>>, vector<8x2x32xf32>,
    return
  }
  func.func @transform_0(%arg0: i32) -> (i32, i32, i32) {
    %c0_i32 = arith.constant 0 : i32
    %c0_i32_0 = arith.constant 0 : i32
    %c0_i32_1 = arith.constant 0 : i32
    return %arg0, %c0_i32, %c0_i32_0 : i32, i32, i32
  }
  func.func @transform_1(%arg0: i32) -> (i32, i32) {
    %c0_i32 = arith.constant 0 : i32
    %c0_i32_0 = arith.constant 0 : i32
    return %arg0, %c0_i32 : i32, i32
  }
  func.func @transform_2(%arg0: i32) -> (i32, i32, i32) {
    %c0_i32 = arith.constant 0 : i32
    %c0_i32_0 = arith.constant 0 : i32
    %c0_i32_1 = arith.constant 0 : i32
    return %arg0, %c0_i32, %c0_i32_0 : i32, i32, i32
  }
}

</mosaic_0001>

<bundles_post_ra>
// kernel: tpu_custom_call.1
= control target key start
LH: loop header
LB: loop body
LE: loop exit
PB: predicated region body
PF: predicated region fallthrough
CT: control target
= control target key end

     0   :  { %7 = vsyncpa [#allocation3], 0  ;;  %s288_s0 = inlined_call_operand.hbm [shape: f32[8,2,32], index: 0, kind: input, shape index: {}]   ;;  %s289_s1 = inlined_call_operand.hbm [shape: f32[8,32], index: 1, kind: input, shape index: {}]   ;;  %s290_s2 = inlined_call_operand.hbm [shape: f32[8,2,32], index: 2, kind: output, shape index: {}]  }
   0x1   :  { %8 = vsyncpa [#allocation6], 0 }
   0x2   :  { %9 = vsyncpa [#allocation4], 0  ;;  %s244_s9 = smov [#allocation2]  }
   0x3   :  { %s15_s10 = sshll.u32 %s244_s9, 4  ;;  %s16_s10 = int_to_ptr.vmem [resolvable:$true] %s15_s10 }
   0x4   :  { %s186_s11 = scalar_lea.vmem %s16_s10, 256  ;;  %p191_p1 = scmp.lt.s32.totalorder %s16_s10, %s16_s10 }
   0x5   :  { %p187_p0 = scmp.ne.s32.totalorder %s16_s10, %s186_s11  ;;  %p192_p2 = scmp.lt.s32.totalorder %s186_s11, %s186_s11 }
   0x7   :  { %p193_p3 = por %p192_p2, %p191_p1 }
   0x9   :  { %p194_p4 = pnand %p193_p3, %p187_p0 }
   0xb   :  { %197 = shalt.err (!%p194_p4)
}
   0xc   :  { %s245_s12 = smov 32   ;;  %s246_s13 = smov 2  }
   0xd   :  { %21 = dma.hbm_to_vmem [thread:$0]  %s288_s0, 256, %s16_s10, [#allocation3], %s245_s12, %s245_s12, %s246_s13  }
   0xe   :  { %s247_s16 = smov [#allocation5]  }
   0xf   :  { %s28_s17 = sshll.u32 %s247_s16, 4  ;;  %s29_s17 = int_to_ptr.vmem [resolvable:$true] %s28_s17 }
  0x10   :  { %s206_s18 = scalar_lea.vmem %s29_s17, 128  ;;  %p211_p6 = scmp.lt.s32.totalorder %s29_s17, %s29_s17 }
  0x11   :  { %p207_p5 = scmp.ne.s32.totalorder %s29_s17, %s206_s18  ;;  %p212_p7 = scmp.lt.s32.totalorder %s206_s18, %s206_s18 }
  0x13   :  { %p213_p8 = por %p212_p7, %p211_p6 }
  0x15   :  { %p214_p9 = pnand %p213_p8, %p207_p5 }
  0x17   :  { %217 = shalt.err (!%p214_p9)
}
  0x18   :  { %31 = dma.hbm_to_vmem [thread:$0]  %s289_s1, 128, %s29_s17, [#allocation6]  }
  0x19   :  { %238 = dma.done.wait [#allocation3], 256  }
  0x1a   :  { %239 = vsyncadd [#allocation3], 4294967040 }
  0x1b   :  { %240 = dma.done.wait [#allocation6], 128  }
  0x1c   :  { %241 = vsyncadd [#allocation6], 4294967168  ;;  %v52_v0 = vlaneseq  ;;  %v248_v1 = vmov 1966171168   ;;  %v46_v6 = vld [vmem:[#allocation5] sm:$0xff]  ;;  %vm145_vm0 = vcmask 254976  }
  0x1d   :  { %v50_v2 = vunpack.c.l.s4 %v248_v1  ;;  %v48_v9 = vcombine.high %v46_v6, %v46_v6  ;;  %v38_v13 = vld [vmem:[#allocation2] sm:$0x3]  ;;  %v39_v18 = vld [vmem:[#allocation2 + $0x2] sm:$0x3]  ;;  %v40_v19 = vld [vmem:[#allocation2 + $0x4] sm:$0x3] }
  0x1e   :  { %v53_v3 = vshrl.u32 %v52_v0, 7  ;;  %v42_v25 = vld [vmem:[#allocation2 + $0x8] sm:$0x3]  ;;  %v41_v26 = vld [vmem:[#allocation2 + $0x6] sm:$0x3]  ;;  %s249_s0 = smov [#allocation7]  }
  0x1f   :  { %v51_v4 = vunpack.c.0.s8 %v50_v2  ;;  %v43_v33 = vld [vmem:[#allocation2 + $0xa] sm:$0x3]  ;;  %v44_v34 = vld [vmem:[#allocation2 + $0xc] sm:$0x3]  ;;  %v45_v40 = vld [vmem:[#allocation2 + $0xe] sm:$0x3] }
  0x20   :  { %v99_v8 = vsub.s32 0, %v53_v3  ;;  %s159_s1 = sshll.u32 %s249_s0, 4  ;;  %s160_s1 = int_to_ptr.vmem [resolvable:$true] %s159_s1 }
  0x21   :  { %v54_v5 = vsub.s32 %v51_v4, %v53_v3  ;;  %s218_s21 = scalar_lea.vmem %s160_s1, 256  ;;  %p223_p11 = scmp.lt.s32.totalorder %s160_s1, %s160_s1 }
  0x22   :  { %p219_p10 = scmp.ne.s32.totalorder %s160_s1, %s218_s21  ;;  %p224_p12 = scmp.lt.s32.totalorder %s218_s21, %s218_s21 }
  0x23   :  { %v55_v7 = vrot.slane %v46_v6, %v54_v5  ;;  %v62_v12 = vrot.slane %v48_v9, %v54_v5 }
  0x24   :  { %p225_p13 = por %p224_p12, %p223_p11 }
  0x25   :  { %v71_v10 = vrot.slane %v55_v7, %v54_v5  ;;  %v63_v11 = vcombine.high %v55_v7, %v55_v7  ;;  %v78_v17 = vrot.slane %v62_v12, %v54_v5  ;;  %v64_v20 = vcombine.high %v62_v12, %v62_v12 }
  0x26   :  { %p226_p0 = pnand %p225_p13, %p219_p10 }
  0x27   :  { %v100_v14 = vrot.slane %v71_v10, %v99_v8  ;;  %v85_v15 = vrot.slane %v63_v11, %v54_v5  ;;  %v93_v16 = vcombine.high %v71_v10, %v71_v10  ;;  %v116_v27 = vrot.slane %v78_v17, %v99_v8 }
  0x28   :  { %v92_v28 = vrot.slane %v64_v20, %v54_v5  ;;  %v94_v29 = vcombine.high %v78_v17, %v78_v17 }
  0x29   :  { %v137_v21 = vadd.f32 %v100_v14, %v38_v13  ;;  %v104_v22 = vrot.slane %v85_v15, %v99_v8  ;;  %v108_v23 = vrot.slane %v93_v16, %v99_v8  ;;  %v95_v24 = vcombine.high %v85_v15, %v85_v15 }
  0x2a   :  { %v141_v35 = vadd.f32 %v116_v27, %v42_v25  ;;  %v120_v36 = vrot.slane %v92_v28, %v99_v8  ;;  %v124_v37 = vrot.slane %v94_v29, %v99_v8  ;;  %v96_v38 = vcombine.high %v92_v28, %v92_v28 }
  0x2b   :  { %146 = vst.msk [vmem:[#allocation7] sm:$0x3] %vm145_vm0, %v137_v21  ;;  %v138_v30 = vadd.f32 %v104_v22, %v39_v18  ;;  %v139_v31 = vadd.f32 %v108_v23, %v40_v19  ;;  %v112_v32 = vrot.slane %v95_v24, %v99_v8 }
  0x2c   :  { %150 = vst.msk [vmem:[#allocation7 + $0x8] sm:$0x3] %vm145_vm0, %v141_v35  ;;  %v142_v41 = vadd.f32 %v120_v36, %v43_v33  ;;  %v143_v42 = vadd.f32 %v124_v37, %v44_v34  ;;  %v128_v43 = vrot.slane %v96_v38, %v99_v8 }
  0x2d   :  { %147 = vst.msk [vmem:[#allocation7 + $0x2] sm:$0x3] %vm145_vm0, %v138_v30  ;;  %148 = vst.msk [vmem:[#allocation7 + $0x4] sm:$0x3] %vm145_vm0, %v139_v31  ;;  %v140_v39 = vadd.f32 %v112_v32, %v41_v26 }
  0x2e   :  { %151 = vst.msk [vmem:[#allocation7 + $0xa] sm:$0x3] %vm145_vm0, %v142_v41  ;;  %152 = vst.msk [vmem:[#allocation7 + $0xc] sm:$0x3] %vm145_vm0, %v143_v42  ;;  %v144_v44 = vadd.f32 %v128_v43, %v45_v40 }
  0x2f   :  { %149 = vst.msk [vmem:[#allocation7 + $0x6] sm:$0x3] %vm145_vm0, %v140_v39 }
  0x30   :  { %153 = vst.msk [vmem:[#allocation7 + $0xe] sm:$0x3] %vm145_vm0, %v144_v44 }
  0x31   :  { %229 = shalt.err (!%p226_p0)
}
  0x32   :  { %165 = dma.vmem_to_hbm [thread:$0]  %s160_s1, 256, %s290_s2, [#allocation4], %s245_s12, %s245_s12, %s246_s13  }
  0x33   :  { %242 = dma.done.wait [#allocation4], 256  }
  0x34   :  { %243 = vsyncadd [#allocation4], 4294967040 }
  0x35   :  { %169 = vsyncpa [#allocation3], 1 }
  0x36   :  { %170 = vsyncpa [#allocation6], 1 }
  0x37   :  { %171 = vsyncpa [#allocation4], 1 }

</bundles_post_ra>
